<compile_context>
chip_gen: v5e
topology: v5e:2x2
jax: 0.10.0
libtpu: 0.0.40
codegen_flags: <defaults>
</compile_context>

<pallas_src>
import jax
import jax.numpy as jnp
from jax.experimental import pallas as pl
from jax.experimental.pallas import tpu as pltpu


# --------------------------------------------------------------------------- #
# Kernel
# --------------------------------------------------------------------------- #
def ffn_kernel(x_ref, w1_ref, b1_ref, w2_ref, b2_ref, w3_ref, b3_ref, out_ref):
    """Fused 3-layer MLP + sigmoid for one batch tile (weights VMEM-resident).

    x/w* are bf16 (MXU inputs), biases are f32; all accumulation and
    elementwise math is f32.
    """
    x = x_ref[...]  # (tb, F_pad) bf16

    # Layer 1: Linear + ReLU   (f32 accumulate on MXU)
    h1 = jnp.dot(x, w1_ref[...], preferred_element_type=jnp.float32)
    h1 = jnp.maximum(h1 + b1_ref[...], 0.0)

    # Dropout: inference-mode identity (PyTorch eval()).
    # TODO(synk): training-mode dropout would use pltpu.prng_seed/prng_random_bits.

    # Layer 2: Linear + ReLU
    h2 = jnp.dot(h1.astype(jnp.bfloat16), w2_ref[...],
                 preferred_element_type=jnp.float32)
    h2 = jnp.maximum(h2 + b2_ref[...], 0.0)

    # Layer 3: Linear + Sigmoid  (sigmoid lowers to the EUP -> its own slot)
    logits = jnp.dot(h2.astype(jnp.bfloat16), w3_ref[...],
                     preferred_element_type=jnp.float32)
    logits = logits + b3_ref[...]
    out_ref[...] = jax.nn.sigmoid(logits).astype(out_ref.dtype)


# --------------------------------------------------------------------------- #
# Wrapper
# --------------------------------------------------------------------------- #
def _round_up(n, m):
    return ((n + m - 1) // m) * m


def _pad_to(a, shape):
    pads = [(0, t - s) for s, t in zip(a.shape, shape)]
    if any(p[1] for p in pads):
        return jnp.pad(a, pads)
    return a


def feed_forward_prediction(x, params, *, batch_tile=None):
    """x: (B, feature_dim) -> (B, num_fabrics). Weights stored as (in_dim, out_dim)."""
    w1, b1, w2, b2, w3, b3 = params
    out_dtype = x.dtype

    B, F = x.shape
    H = w1.shape[1]
    NF = w3.shape[1]

    # Lane-dense padded dims (multiples of 128 on the lane axis).
    F_pad = _round_up(F, 128)
    H_pad = _round_up(H, 128)
    NF_pad = _round_up(NF, 128)

    # Batch tile: multiple of 8, capped so the grid has many steps at real sizes.
    tb = batch_tile if batch_tile is not None else min(512, _round_up(B, 8))
    tb = max(8, _round_up(tb, 8))
    B_pad = _round_up(B, tb)

    # Zero-padding is numerically exact through Linear / ReLU; padded output
    # rows/cols are sliced off below.
    x_p = _pad_to(x, (B_pad, F_pad)).astype(jnp.bfloat16)
    w1_p = _pad_to(w1, (F_pad, H_pad)).astype(jnp.bfloat16)
    b1_p = _pad_to(b1, (1, H_pad)).astype(jnp.float32)
    w2_p = _pad_to(w2, (H_pad, F_pad)).astype(jnp.bfloat16)
    b2_p = _pad_to(b2, (1, F_pad)).astype(jnp.float32)
    w3_p = _pad_to(w3, (F_pad, NF_pad)).astype(jnp.bfloat16)
    b3_p = _pad_to(b3, (1, NF_pad)).astype(jnp.float32)

    grid = (B_pad // tb,)

    # Constant-index weights/biases: DMA'd once, stay VMEM-resident across tiles.
    def const_spec(shape):
        return pl.BlockSpec(shape, lambda i: (0, 0))

    # VMEM budget: double-buffered x/out tiles + resident weights + f32 intermediates.
    weight_bytes = (F_pad * H_pad + H_pad * F_pad + F_pad * NF_pad) * 2
    bias_bytes = (H_pad + F_pad + NF_pad) * 4
    tile_bytes = tb * F_pad * 2 + tb * NF_pad * jnp.dtype(out_dtype).itemsize
    interm_bytes = tb * (H_pad + F_pad + NF_pad) * 4
    est = 2 * (weight_bytes + bias_bytes + tile_bytes) + interm_bytes
    vmem_limit = int(max(32 * 2**20, min(96 * 2**20, 2 * est)))

    cost = pl.CostEstimate(
        flops=2 * B_pad * (F_pad * H_pad + H_pad * F_pad + F_pad * NF_pad),
        transcendentals=B_pad * NF_pad,
        bytes_accessed=int(x_p.size * 2 + weight_bytes + bias_bytes
                           + B_pad * NF_pad * jnp.dtype(out_dtype).itemsize),
    )

    out_padded = pl.pallas_call(
        ffn_kernel,
        out_shape=jax.ShapeDtypeStruct((B_pad, NF_pad), out_dtype),
        grid_spec=pltpu.PrefetchScalarGridSpec(
            num_scalar_prefetch=0,
            grid=grid,
            in_specs=[
                pl.BlockSpec((tb, F_pad), lambda i: (i, 0)),  # x tile (bf16)
                const_spec((F_pad, H_pad)),                   # w1 (bf16)
                const_spec((1, H_pad)),                       # b1 (f32)
                const_spec((H_pad, F_pad)),                   # w2 (bf16)
                const_spec((1, F_pad)),                       # b2 (f32)
                const_spec((F_pad, NF_pad)),                  # w3 (bf16)
                const_spec((1, NF_pad)),                      # b3 (f32)
            ],
            out_specs=pl.BlockSpec((tb, NF_pad), lambda i: (i, 0)),
        ),
        compiler_params=pltpu.CompilerParams(
            dimension_semantics=("parallel",),
            vmem_limit_bytes=vmem_limit,
        ),
        cost_estimate=cost,
    )(x_p, w1_p, b1_p, w2_p, b2_p, w3_p, b3_p)

    return out_padded[:B, :NF]


# --------------------------------------------------------------------------- #
# Params / reference
# --------------------------------------------------------------------------- #
def init_params(key, feature_dim, higher_dim, num_fabrics, dtype=jnp.float32):
    """nn.Linear default init: U(-1/sqrt(fan_in), 1/sqrt(fan_in)); W stored (in, out)."""
    def linear(k, fan_in, fan_out):
        kw, kb = jax.random.split(k)
        bound = 1.0 / jnp.sqrt(fan_in)
        w = jax.random.uniform(kw, (fan_in, fan_out), dtype, -bound, bound)
        b = jax.random.uniform(kb, (1, fan_out), dtype, -bound, bound)
        return w, b

    k1, k2, k3 = jax.random.split(key, 3)
    w1, b1 = linear(k1, feature_dim, higher_dim)
    w2, b2 = linear(k2, higher_dim, feature_dim)
    w3, b3 = linear(k3, feature_dim, num_fabrics)
    return (w1, b1, w2, b2, w3, b3)


def reference(x, params):
    """Pure-JAX f32 reference matching the PyTorch module in eval mode."""
    w1, b1, w2, b2, w3, b3 = params
    h1 = jnp.maximum(x @ w1 + b1, 0.0)
    h2 = jnp.maximum(h1 @ w2 + b2, 0.0)
    return jax.nn.sigmoid(h2 @ w3 + b3)


# --------------------------------------------------------------------------- #
# Test
# --------------------------------------------------------------------------- #
if __name__ == "__main__":
    # Small shapes consistent with the module's forward: x is (batch, feature_dim).
    # batch=12 (not a multiple of the tile) + batch_tile=8 exercises the ragged-batch
    # padding path and a multi-step grid.
    batch, feature_dim, higher_dim, num_fabrics = 12, 32, 64, 8

    key = jax.random.PRNGKey(0)
    kx, kp = jax.random.split(key)
    x = jax.random.normal(kx, (batch, feature_dim), dtype=jnp.float32)
    params = init_params(kp, feature_dim, higher_dim, num_fabrics)

    out = feed_forward_prediction(x, params, batch_tile=8)
    out = jax.block_until_ready(out)

    ref = reference(x, params)
    assert out.shape == (batch, num_fabrics)
    # bf16 MXU path vs. f32 reference: tolerance sized for bf16 rounding on [0,1] outputs.
    assert jnp.allclose(out, ref, atol=2e-2, rtol=2e-2), "mismatch vs. pure-JAX reference"

    print("KERNEL_OK")
</pallas_src>

<mosaic_0001>
module attributes {stable_mosaic.version = 11 : i64} {
  func.func @ffn_kernel(%arg0: i32, %arg1: memref<8x128xbf16, #tpu.memory_space<vmem>>, %arg2: memref<128x128xbf16, #tpu.memory_space<vmem>>, %arg3: memref<1x128xf32, #tpu.memory_space<vmem>>, %arg4: memref<128x128xbf16, #tpu.memory_space<vmem>>, %arg5: memref<1x128xf32, #tpu.memory_space<vmem>>, %arg6: memref<128x128xbf16, #tpu.memory_space<vmem>>, %arg7: memref<1x128xf32, #tpu.memory_space<vmem>>, %arg8: memref<8x128xf32, #tpu.memory_space<vmem>>) attributes {dimension_semantics = [#tpu.dimension_semantics<parallel>], iteration_bounds = array<i64: 2>, scalar_prefetch = 0 : i64, scratch_operands = 0 : i64, tpu.core_type = #tpu.core_type<tc>, window_params = [{transform_indices = @transform_0, window_bounds = array<i64: 8, 128>}, {pipeline_mode = #tpu.pipeline_mode<synchronous>, transform_indices = @transform_1, window_bounds = array<i64: 128, 128>}, {pipeline_mode = #tpu.pipeline_mode<synchronous>, transform_indices = @transform_2, window_bounds = array<i64: 1, 128>}, {pipeline_mode = #tpu.pipeline_mode<synchronous>, transform_indices = @transform_3, window_bounds = array<i64: 128, 128>}, {pipeline_mode = #tpu.pipeline_mode<synchronous>, transform_indices = @transform_4, window_bounds = array<i64: 1, 128>}, {pipeline_mode = #tpu.pipeline_mode<synchronous>, transform_indices = @transform_5, window_bounds = array<i64: 128, 128>}, {pipeline_mode = #tpu.pipeline_mode<synchronous>, transform_indices = @transform_6, window_bounds = array<i64: 1, 128>}, {transform_indices = @transform_7, window_bounds = array<i64: 8, 128>}]} {
    %c0 = arith.constant 0 : index
    %c0_0 = arith.constant 0 : index
    %0 = vector.load %arg1[%c0, %c0_0] : memref<8x128xbf16, #tpu.memory_space<vmem>>, vector<8x128xbf16>
    %c0_1 = arith.constant 0 : index
    %c0_2 = arith.constant 0 : index
    %1 = vector.load %arg2[%c0_1, %c0_2] : memref<128x128xbf16, #tpu.memory_space<vmem>>, vector<128x128xbf16>
    %cst = arith.constant dense<0.000000e+00> : vector<8x128xf32>
    %2 = tpu.matmul %0, %1, %cst {dimension_numbers = #tpu.dot_dimension_numbers<[1], [0], [0], [1], [0, 0, 1, 1], [], []>} : vector<8x128xbf16>, vector<128x128xbf16>, vector<8x128xf32> -> vector<8x128xf32>
    %c0_3 = arith.constant 0 : index
    %c0_4 = arith.constant 0 : index
    %3 = vector.load %arg3[%c0_3, %c0_4] : memref<1x128xf32, #tpu.memory_space<vmem>>, vector<1x128xf32>
    %4 = vector.broadcast %3 : vector<1x128xf32> to vector<8x128xf32>
    %5 = arith.addf %2, %4 : vector<8x128xf32>
    %cst_5 = arith.constant 0.000000e+00 : f32
    %6 = vector.broadcast %cst_5 : f32 to vector<8x128xf32>
    %7 = arith.maximumf %5, %6 : vector<8x128xf32>
    %8 = arith.truncf %7 : vector<8x128xf32> to vector<8x128xbf16>
    %c0_6 = arith.constant 0 : index
    %c0_7 = arith.constant 0 : index
    %9 = vector.load %arg4[%c0_6, %c0_7] : memref<128x128xbf16, #tpu.memory_space<vmem>>, vector<128x128xbf16>
    %cst_8 = arith.constant dense<0.000000e+00> : vector<8x128xf32>
    %10 = tpu.matmul %8, %9, %cst_8 {dimension_numbers = #tpu.dot_dimension_numbers<[1], [0], [0], [1], [0, 0, 1, 1], [], []>} : vector<8x128xbf16>, vector<128x128xbf16>, vector<8x128xf32> -> vector<8x128xf32>
    %c0_9 = arith.constant 0 : index
    %c0_10 = arith.constant 0 : index
    %11 = vector.load %arg5[%c0_9, %c0_10] : memref<1x128xf32, #tpu.memory_space<vmem>>, vector<1x128xf32>
    %12 = vector.broadcast %11 : vector<1x128xf32> to vector<8x128xf32>
    %13 = arith.addf %10, %12 : vector<8x128xf32>
    %cst_11 = arith.constant 0.000000e+00 : f32
    %14 = vector.broadcast %cst_11 : f32 to vector<8x128xf32>
    %15 = arith.maximumf %13, %14 : vector<8x128xf32>
    %16 = arith.truncf %15 : vector<8x128xf32> to vector<8x128xbf16>
    %c0_12 = arith.constant 0 : index
    %c0_13 = arith.constant 0 : index
    %17 = vector.load %arg6[%c0_12, %c0_13] : memref<128x128xbf16, #tpu.memory_space<vmem>>, vector<128x128xbf16>
    %cst_14 = arith.constant dense<0.000000e+00> : vector<8x128xf32>
    %18 = tpu.matmul %16, %17, %cst_14 {dimension_numbers = #tpu.dot_dimension_numbers<[1], [0], [0], [1], [0, 0, 1, 1], [], []>} : vector<8x128xbf16>, vector<128x128xbf16>, vector<8x128xf32> -> vector<8x128xf32>
    %c0_15 = arith.constant 0 : index
    %c0_16 = arith.constant 0 : index
    %19 = vector.load %arg7[%c0_15, %c0_16] : memref<1x128xf32, #tpu.memory_space<vmem>>, vector<1x128xf32>
    %20 = vector.broadcast %19 : vector<1x128xf32> to vector<8x128xf32>
    %21 = arith.addf %18, %20 : vector<8x128xf32>
    %22 = arith.negf %21 : vector<8x128xf32>
    %23 = math.exp %22 : vector<8x128xf32>
    %cst_17 = arith.constant 1.000000e+00 : f32
    %24 = vector.broadcast %cst_17 : f32 to vector<8x128xf32>
    %25 = arith.addf %24, %23 : vector<8x128xf32>
    %26 = arith.divf %24, %25 : vector<8x128xf32>
    %c0_18 = arith.constant 0 : index
    %c0_19 = arith.constant 0 : index
    %27 = vector.load %arg8[%c0_18, %c0_19] : memref<8x128xf32, #tpu.memory_space<vmem>>, vector<8x128xf32>
    tpu.vector_store %arg8[%c0_18, %c0_19], %26 {strides = array<i32>} : memref<8x128xf32, #tpu.memory_space<vmem>>, vector<8x128xf32>,
    return
  }
  func.func @transform_0(%arg0: i32) -> (i32, i32) {
    %c0_i32 = arith.constant 0 : i32
    %c0_i32_0 = arith.constant 0 : i32
    return %arg0, %c0_i32 : i32, i32
  }
  func.func @transform_1(%arg0: i32) -> (i32, i32) {
    %c0_i32 = arith.constant 0 : i32
    %c0_i32_0 = arith.constant 0 : i32
    %c0_i32_1 = arith.constant 0 : i32
    return %c0_i32, %c0_i32_0 : i32, i32
  }
  func.func @transform_2(%arg0: i32) -> (i32, i32) {
    %c0_i32 = arith.constant 0 : i32
    %c0_i32_0 = arith.constant 0 : i32
    %c0_i32_1 = arith.constant 0 : i32
    return %c0_i32, %c0_i32_0 : i32, i32
  }
  func.func @transform_3(%arg0: i32) -> (i32, i32) {
    %c0_i32 = arith.constant 0 : i32
    %c0_i32_0 = arith.constant 0 : i32
    %c0_i32_1 = arith.constant 0 : i32
    return %c0_i32, %c0_i32_0 : i32, i32
  }
  func.func @transform_4(%arg0: i32) -> (i32, i32) {
    %c0_i32 = arith.constant 0 : i32
    %c0_i32_0 = arith.constant 0 : i32
    %c0_i32_1 = arith.constant 0 : i32
    return %c0_i32, %c0_i32_0 : i32, i32
  }
  func.func @transform_5(%arg0: i32) -> (i32, i32) {
    %c0_i32 = arith.constant 0 : i32
    %c0_i32_0 = arith.constant 0 : i32
    %c0_i32_1 = arith.constant 0 : i32
    return %c0_i32, %c0_i32_0 : i32, i32
  }
  func.func @transform_6(%arg0: i32) -> (i32, i32) {
    %c0_i32 = arith.constant 0 : i32
    %c0_i32_0 = arith.constant 0 : i32
    %c0_i32_1 = arith.constant 0 : i32
    return %c0_i32, %c0_i32_0 : i32, i32
  }
  func.func @transform_7(%arg0: i32) -> (i32, i32) {
    %c0_i32 = arith.constant 0 : i32
    %c0_i32_0 = arith.constant 0 : i32
    return %arg0, %c0_i32 : i32, i32
  }
}

</mosaic_0001>

<bundles_post_ra>
// kernel: tpu_custom_call.1
= control target key start
LH: loop header
LB: loop body
LE: loop exit
PB: predicated region body
PF: predicated region fallthrough
CT: control target
= control target key end

     0   :  { %s1364_s0 = inlined_call_operand.hbm [shape: bf16[16,128], index: 0, kind: input, shape index: {}]   ;;  %s1365_s1 = inlined_call_operand.hbm [shape: bf16[128,128], index: 1, kind: input, shape index: {}]   ;;  %s1366_s2 = inlined_call_operand.vmem [shape: f32[1,128], index: 2, kind: input, shape index: {}]   ;;  %s1367_s3 = inlined_call_operand.hbm [shape: bf16[128,128], index: 3, kind: input, shape index: {}]   ;;  %s1368_s4 = inlined_call_operand.vmem [shape: f32[1,128], index: 4, kind: input, shape index: {}]   ;;  %s1369_s5 = inlined_call_operand.hbm [shape: bf16[128,128], index: 5, kind: input, shape index: {}]   ;;  %s1370_s6 = inlined_call_operand.vmem [shape: f32[1,128], index: 6, kind: input, shape index: {}]   ;;  %s1371_s7 = inlined_call_operand.hbm [shape: f32[16,128], index: 7, kind: output, shape index: {}]  }
   0x1   :  { %1372 = sst [smem:[#allocation15_spill]] %s1365_s1 }
   0x2   :  { %12 = vsyncpa [#allocation3], 0 }
   0x3   :  { %14 = vsyncpa [#allocation3 + $0x1], 0 }
   0x4   :  { %15 = vsyncpa [#allocation6], 0 }
   0x5   :  { %16 = vsyncpa [#allocation9], 0 }
   0x6   :  { %17 = vsyncpa [#allocation4], 0 }
   0x7   :  { %19 = vsyncpa [#allocation4 + $0x1], 0  ;;  %s1195_s24 = smov 0   ;;  %s1197_s25 = smov 0  }
   0x8   :  { %s1199_s26 = smov 0   ;;  %s1201_s27 = smov 0  }
   0x9 LB: > { %s1373_s1 = sld [smem:[#allocation15_spill]]  ;;  %s1219_s8 = sadd.s32 4294967295, %s1148_s27   ;;  %s1148_s27 = sphi %s1201_s27, %s1384_s27   ;;  %s1144_s26 = sphi %s1199_s26, %s1383_s26   ;;  %s1140_s25 = sphi %s1197_s25, %s1382_s25   ;;  %s1136_s24 = sphi %s1195_s24, %s1381_s24  }
   0xa   : > { %p730_p0 = scmp.ge.s32.totalorder %s1148_s27, 1  ;;  %p46_p1 = scmp.eq.s32.totalorder %s1219_s8, 0 }
   0xb   : > { %p208_p2 = scmp.lt.s32.totalorder %s1148_s27, 3  ;;  %s1150_s10 = smov [#allocation5]  }
   0xc   : > { %s221_s11 = sshll.u32 %s1150_s10, 4  ;;  %s236_s14 = sshll.u32 %s1367_s3, 4  ;;  %s222_s11 = int_to_ptr.vmem [resolvable:$true] %s221_s11  ;;  %s237_s14 = int_to_ptr.hbm [resolvable:$true] %s236_s14 }
   0xd   : > { %p1224_p3 = pnand %p730_p0, %p208_p2  ;;  %s253_s18 = sshll.u32 %s1369_s5, 4  ;;  %s254_s18 = int_to_ptr.hbm [resolvable:$true] %s253_s18 }
   0xe   : > { %s1151_s19 = smov [#allocation7]   ;;  %s1152_s21 = smov 64  }
   0xf   : > { %s219_s30 = sshll.u32 %s1373_s1, 4  ;;  %p884_p4 = pneg %p1224_p3  ;;  %s220_s30 = int_to_ptr.hbm [resolvable:$true] %s219_s30 }
  0x10   : > { %s238_s20 = sshll.u32 %s1151_s19, 4  ;;  %s1153_s22 = smov 4   ;;  %s239_s20 = int_to_ptr.vmem [resolvable:$true] %s238_s20 }
  0x11   : > { %p1236_p6 = pnand %p884_p4, %p46_p1  ;;  %s1154_s23 = smov [#allocation8]  }
  0x12   : > { %s255_s28 = sshll.u32 %s1154_s23, 4  ;;  %s729_s29 = sadd.s32 4294967294, %s1148_s27   ;;  %s256_s28 = int_to_ptr.vmem [resolvable:$true] %s255_s28 }
  0x13   : > { %887 = dma.hbm_to_vmem [thread:$0]  (!%p1236_p6), %s220_s30, 1024, %s222_s11, [#allocation6], %s1152_s21, %s1152_s21, %s1153_s22  }
  0x14   : > { %890 = dma.hbm_to_vmem [thread:$0]  (!%p1236_p6), %s237_s14, 1024, %s239_s20, [#allocation6], %s1152_s21, %s1152_s21, %s1153_s22  }
  0x15   : > { %893 = dma.hbm_to_vmem [thread:$0]  (!%p1236_p6), %s254_s18, 1024, %s256_s28, [#allocation9], %s1152_s21, %s1152_s21, %s1153_s22  }
  0x16   : > { %s1251_s10 = sadd.s32 1, %s1148_s27   ;;  %s32_s12 = sadd.s32 1, %s1144_s26 }
  0x17   : > { %s29_s30 = ssub.s32 %s1148_s27, %s1251_s10  ;;  %p39_p7 = scmp.ne.s32.totalorder %s1144_s26, %s1140_s25 }
  0x18   : > { %p30_p8 = scmp.eq.s32.totalorder %s29_s30, 0  ;;  %p40_p9 = scmp.eq.s32.totalorder %s1148_s27, 0 }
  0x19   : > { %p45_p10 = scmp.ne.s32.totalorder %s1140_s25, %s1136_s24  ;;  %p195_p11 = scmp.eq.s32.totalorder %s1219_s8, 1 }
  0x1a   : > { %s1263_s11 = scalar_select %p30_p8, %s1144_s26, %s32_s12  }
  0x1b   : > { %p1267_p12 = por %p46_p1, %p45_p10  ;;  %p1271_p13 = por %p195_p11, %p39_p7 }
  0x1c   : > { %p201_p0 = scmp.eq.s32.totalorder %s729_s29, 1  ;;  %p41_p2 = por %p40_p9, %p39_p7 }
  0x1d   : > { %s272_s15 = sand.u32 1, %s1144_s26   ;;  %p905_p6 = scmp.lt.s32.totalorder %s1148_s27, 2 }
  0x1e   : > { %p1276_p4 = por %p201_p0, %p45_p10  ;;  %s735_s17 = sshll.u32 %s272_s15, 2 }
  0x1f   : > { %s736_s18 = sshll.u32 %s1148_s27, 2  ;;  %s276_s23 = scalar_lea.vmem [#allocation2], %s735_s17 }
  0x20   : > { %s280_s21 = scalar_lea.hbm %s1364_s0, %s736_s18  ;;  %s284_s28 = sshll.u32 %s276_s23, 4  ;;  %s285_s28 = int_to_ptr.vmem [resolvable:$true] %s284_s28 }
  0x21   : > { %s282_s22 = sshll.u32 %s280_s21, 4  ;;  %p1285_p8 = pnand %p905_p6, %p41_p2  ;;  %s283_s22 = int_to_ptr.hbm [resolvable:$true] %s282_s22 }
  0x22   : > { %s273_s12 = scalar_lea.sflag [#allocation3], %s272_s15  ;;  %s1044_s30 = sshra.s32 %s283_s22, 4  ;;  %s1045_s30 = int_to_ptr.hbm [resolvable:$true] %s1044_s30 }
  0x23   : > { %s1046_s1 = scalar_lea.hbm %s1045_s30, 4  ;;  %p1048_p9 = pneg %p1285_p8 }
  0x24   : > { %p1047_p7 = scmp.ne.s32.totalorder %s1045_s30, %s1046_s1  ;;  %s1051_s17 = scalar_lea.hbm %s1364_s0, 8 }
  0x25   : > { %p1052_p0 = scmp.lt.s32.totalorder %s1045_s30, %s1364_s0  ;;  %p1053_p2 = scmp.lt.s32.totalorder %s1051_s17, %s1046_s1 }
  0x26   : > { %p1049_p10 = pnand %p1048_p9, %p1047_p7 }
  0x27   : > { %p1054_p6 = por %p1053_p2, %p1052_p0 }
  0x28   : > { %p1050_p11 = pneg %p1049_p10 }
  0x2a   : > { %p1055_p5 = pnand %p1054_p6, %p1050_p11 }
  0x2c   : > { %1058 = shalt.err (!%p1055_p5)
}
  0x2d   : > { %897 = dma.hbm_to_vmem [thread:$0]  (!%p1285_p8), %s283_s22, 64, %s285_s28, %s273_s12  }
  0x2e   : > { %293 = sbr.rel (%p1224_p3) target bundleno = 517 (0x205), region = 48  ;;  %s1302_s15 = sand.u32 (!%p1224_p3), 1, %s1140_s25  }
  0x2f   : > { %s738_s23 = sshll.u32 (!%p1224_p3), %s1302_s15, 2  ;;  %s296_s18 = scalar_lea.sflag (!%p1224_p3), [#allocation3], %s1302_s15 }
  0x30   : > { %s1306_s19 = scalar_lea.vmem (!%p1224_p3), [#allocation2], %s738_s23 }
  0x33   : > { %1119 = dma.done.wait (%p1267_p12), %s296_s18, 64  }
  0x34   : > { %1121 = vsyncadd (%p1267_p12), %s296_s18, 4294967232 }
  0x35   : > { %1123 = dma.done.wait (%p46_p1), [#allocation6], 2048  }
  0x36   : > { %1125 = vsyncadd (%p46_p1), [#allocation6], 4294965248 }
  0x37   : > { %1127 = dma.done.wait (%p46_p1), [#allocation9], 1024  }
  0x38   : > { %1129 = vsyncadd (%p46_p1), [#allocation9], 4294966272  ;;  %v851_v0 = vld [vmem:[#allocation5 + $0x38] sm:$0xff]  ;;  %v850_v1 = vld [vmem:[#allocation5 + $0x30] sm:$0xff]  ;;  %s742_s12 = sshll.u32 %s1302_s15, 3  ;;  %s841_s30 = sshll.u32 %s1219_s8, 3 }
  0x39   : > { %415 = vmatpush.bf16.msra.mxu0 %v851_v0  ;;  %v859_v2 = vld [vmem:[#allocation7 + $0x38] sm:$0xff]  ;;  %v858_v3 = vld [vmem:[#allocation7 + $0x30] sm:$0xff]  ;;  %v849_v4 = vld [vmem:[#allocation5 + $0x28] sm:$0xff]  ;;  %s625_s21 = scalar_lea.hbm %s1371_s7, %s841_s30  ;;  %s345_s23 = scalar_lea.vmem [#allocation10], %s742_s12 }
  0x3a   : > { %498 = vmatpush.bf16.msra.mxu1 %v859_v2  ;;  %v857_v5 = vld [vmem:[#allocation7 + $0x28] sm:$0xff]  ;;  %v848_v6 = vld [vmem:[#allocation5 + $0x20] sm:$0xff]  ;;  %v847_v8 = vld [vmem:[#allocation5 + $0x18] sm:$0xff]  ;;  %s627_s18 = sshll.u32 %s345_s23, 4  ;;  %s615_s8 = scalar_lea.sflag [#allocation4], %s1302_s15  ;;  %s628_s18 = int_to_ptr.vmem [resolvable:$true] %s627_s18 }
  0x3b   : > { %v856_v7 = vld [vmem:[#allocation7 + $0x20] sm:$0xff]  ;;  %v855_v9 = vld [vmem:[#allocation7 + $0x18] sm:$0xff]  ;;  %v846_v10 = vld [vmem:[#allocation5 + $0x10] sm:$0xff]  ;;  %s1094_s28 = scalar_lea.hbm %s1371_s7, 16 }
  0x3c   : > { %v854_v11 = vld [vmem:[#allocation7 + $0x10] sm:$0xff]  ;;  %v845_v12 = vld [vmem:[#allocation5 + $0x8] sm:$0xff]  ;;  %v844_v13 = vld [vmem:[#allocation5] sm:$0xff] }
  0x3d   : > { %416 = vmatpush.bf16.msra.mxu0 %v850_v1  ;;  %v346_v14 = vld [vmem:[%s1306_s19] sm:$0xf]  ;;  %v853_v15 = vld [vmem:[#allocation7 + $0x8] sm:$0xff]  ;;  %v852_v16 = vld [vmem:[#allocation7] sm:$0xff]  ;;  %s629_s19 = sshll.u32 %s625_s21, 4  ;;  %s630_s19 = int_to_ptr.hbm [resolvable:$true] %s629_s19 }
  0x3e   : > { %499 = vmatpush.bf16.msra.mxu1 %v858_v3  ;;  %v867_v17 = vld [vmem:[#allocation8 + $0x38] sm:$0xff]  ;;  %v866_v18 = vld [vmem:[#allocation8 + $0x30] sm:$0xff]  ;;  %v865_v19 = vld [vmem:[#allocation8 + $0x28] sm:$0xff]  ;;  %s1088_s1 = sshra.s32 %s630_s19, 4  ;;  %s1089_s1 = int_to_ptr.hbm [resolvable:$true] %s1088_s1 }
  0x3f   : > { %581 = vmatpush.bf16.msra.mxu2 %v867_v17  ;;  %v864_v20 = vld [vmem:[#allocation8 + $0x20] sm:$0xff]  ;;  %v863_v21 = vld [vmem:[#allocation8 + $0x18] sm:$0xff]  ;;  %v862_v22 = vld [vmem:[#allocation8 + $0x10] sm:$0xff]  ;;  %s1090_s9 = scalar_lea.hbm %s1089_s1, 8  ;;  %p1095_p12 = scmp.lt.s32.totalorder %s1089_s1, %s1371_s7 }
  0x40   : > { %v947_v23 = vld [vmem:[%s1366_s2] ss:$0 sm:$0xff]  ;;  %v861_v29 = vld [vmem:[#allocation8 + $0x8] sm:$0xff]  ;;  %v860_v30 = vld [vmem:[#allocation8] sm:$0xff]  ;;  %p1091_p1 = scmp.ne.s32.totalorder %s1089_s1, %s1090_s9  ;;  %p1096_p8 = scmp.lt.s32.totalorder %s1094_s28, %s1090_s9 }
  0x41   : > { %417 = vmatpush.bf16.msra.mxu0 %v849_v4  ;;  %v948_v31 = vld [vmem:[%s1368_s4] ss:$0 sm:$0xff] }
  0x42   : > { %500 = vmatpush.bf16.msra.mxu1 %v857_v5  ;;  %v949_v37 = vld [vmem:[%s1370_s6] ss:$0 sm:$0xff]  ;;  %p1092_p3 = pnand %p1091_p1, %p1271_p13  ;;  %p1097_p7 = por %p1096_p8, %p1095_p12 }
  0x43   : > { %582 = vmatpush.bf16.msra.mxu2 %v866_v18 }
  0x44   : > { %p1093_p5 = pneg %p1092_p3 }
  0x45   : > { %418 = vmatpush.bf16.msra.mxu0 %v848_v6 }
  0x46   : > { %501 = vmatpush.bf16.msra.mxu1 %v856_v7  ;;  %p1098_p9 = pnand %p1097_p7, %p1093_p5 }
  0x47   : > { %583 = vmatpush.bf16.msra.mxu2 %v865_v19 }
  0x49   : > { %419 = vmatpush.bf16.msra.mxu0 %v847_v8 }
  0x4a   : > { %502 = vmatpush.bf16.msra.mxu1 %v855_v9 }
  0x4b   : > { %584 = vmatpush.bf16.msra.mxu2 %v864_v20 }
  0x4d   : > { %420 = vmatpush.bf16.msra.mxu0 %v846_v10 }
  0x4e   : > { %503 = vmatpush.bf16.msra.mxu1 %v854_v11 }
  0x4f   : > { %585 = vmatpush.bf16.msra.mxu2 %v863_v21 }
  0x51   : > { %421 = vmatpush.bf16.msra.mxu0 %v845_v12 }
  0x52   : > { %504 = vmatpush.bf16.msra.mxu1 %v853_v15 }
  0x53   : > { %586 = vmatpush.bf16.msra.mxu2 %v862_v22 }
  0x55   : > { %422 = vmatpush.bf16.msra.mxu0 %v844_v13 }
  0x56   : > { %505 = vmatpush.bf16.msra.mxu1 %v852_v16 }
  0x57   : > { %587 = vmatpush.bf16.msra.mxu2 %v861_v29 }
  0x58   : > { %423 = vmatmul.bf16.vlgmr.msra.gmra.mxu0 %v346_v14 }
  0x5b   : > { %588 = vmatpush.bf16.msra.mxu2 %v860_v30 }
  0xd5   : > { %v424_v24 = vpop.f32.mrf.mxu0 }
  0xd6   : > { %v425_v25 = vadd.f32 %v947_v23, %v424_v24 }
  0xd8   : > { %v428_v26 = vmax.f32 %v425_v25, 0.0 }
  0xda   : > { %v429_v27 = vpack.c.bf16 %v428_v26, %v428_v26 }
  0xdc   : > { %506 = vmatmul.bf16.vlgmr.msra.gmra.mxu1 %v429_v27 }
  0xdd   : > { %v426_v28 = vpop.f32.mrf.mxu0 }
 0x159   : > { %v507_v32 = vpop.f32.mrf.mxu1 }
 0x15a   : > { %v508_v33 = vadd.f32 %v948_v31, %v507_v32 }
 0x15c   : > { %v511_v34 = vmax.f32 %v508_v33, 0.0 }
 0x15e   : > { %v512_v35 = vpack.c.bf16 %v511_v34, %v511_v34 }
 0x160   : > { %589 = vmatmul.bf16.vlgmr.msra.gmra.mxu2 %v512_v35 }
 0x161   : > { %v509_v36 = vpop.f32.mrf.mxu1 }
 0x1e3   : > { %v590_v38 = vpop.f32.mrf.mxu2 }
 0x1e4   : > { %v591_v39 = vadd.f32 %v949_v37, %v590_v38 }
 0x1e6   : > { %v839_v40 = vmul.f32 -1.442695, %v591_v39 }
 0x1e8   : > { %950 = vpow2.f32 %v839_v40 }
 0x1eb   : > { %v592_v41 = vpop.f32.mrf.mxu2 }
 0x1ee   : > { %v951_v42 = vpop.eup %950 }
 0x1ef   : > { %v597_v43 = vadd.f32 1.0, %v951_v42 }
 0x1f1   : > { %952 = vrcp.f32 %v597_v43  ;;  %v609_v47 = vand.u32 2147483648, %v597_v43  ;;  %v607_v49 = vand.u32 2147483647, %v597_v43  ;;  %vm603_vm1 = vweird.f32 %v597_v43 }
 0x1f3   : > { %v610_v51 = vor.u32 1.1754944e-38, %v609_v47  ;;  %vm608_vm3 = vcmp.eq.f32.partialorder %v607_v49, 8.507059e+37 }
 0x1f7   : > { %v953_v44 = vpop.eup %952 }
 0x1f8   : > { %v599_v45 = vmul.f32 %v953_v44, %v597_v43  ;;  %vm604_vm0 = vweird.f32 %v953_v44 }
 0x1f9   : > { %vm605_vm2 = vmor %vm603_vm1, %vm604_vm0 }
 0x1fa   : > { %v600_v46 = vsub.f32 1.0, %v599_v45 }
 0x1fc   : > { %v601_v48 = vmul.f32 %v953_v44, %v600_v46 }
 0x1fe   : > { %v602_v50 = vadd.f32 %v953_v44, %v601_v48 }
 0x200   : > { %v606_v52 = vsel %vm605_vm2, %v953_v44, %v602_v50 }
 0x201   : > { %v611_v53 = vsel %vm608_vm3, %v610_v51, %v606_v52 }
 0x202   : > { %613 = vst [vmem:[%s345_s23] sm:$0xff] %v611_v53 }
 0x203   : > { %1101 = shalt.err (!%p1098_p9)
}
 0x204   : > { %882 = dma.vmem_to_hbm [thread:$0]  (%p1271_p13), %s628_s18, 128, %s630_s19, %s615_s8  }
 0x205 PF: > { %s641_s15 = sand.u32 1, %s1136_s24   ;;  %p1380_p10 = scmp.ge.s32.totalorder %s1148_s27, 2 }
 0x206   : > { %s642_s30 = scalar_lea.sflag [#allocation4], %s641_s15 }
 0x207   : > { %p899_p11 = pnand %p1380_p10, %p1276_p4 }
 0x209   : > { %p900_p0 = pneg %p899_p11 }
 0x20b   : > { %1131 = dma.done.wait (%p900_p0), %s642_s30, 128  }
 0x20c   : > { %1133 = vsyncadd (%p900_p0), %s642_s30, 4294967168  ;;  %p22_p2 = scmp.ge.s32.totalorder %s1251_s10, 4   ;;  %s1381_s24 = smov %s1140_s25 }
 0x20d   : > { %s1382_s25 = smov %s1144_s26  ;;  %s1383_s26 = smov %s1263_s11 }
 0x20e   : > { %s1384_s27 = smov %s1251_s10  ;;  %24 = sbr.rel (!%p22_p2) target bundleno = 9 (0x9), region = 105 }
 0x213   :  { %648 = vsyncpa [#allocation3], 1 }
 0x214   :  { %650 = vsyncpa [#allocation3 + $0x1], 1 }
 0x215   :  { %651 = vsyncpa [#allocation6], 1 }
 0x216   :  { %652 = vsyncpa [#allocation9], 1 }
 0x217   :  { %653 = vsyncpa [#allocation4], 1 }
 0x218   :  { %655 = vsyncpa [#allocation4 + $0x1], 1 }

</bundles_post_ra>
